<compile_context>
chip_gen: v7x
topology: tpu7x:2x2x1
jax: 0.10.0
libtpu: 0.0.40
codegen_flags: <defaults>
</compile_context>

<pallas_src>
import functools
import math

import jax
import jax.numpy as jnp
from jax.experimental import pallas as pl
from jax.experimental.pallas import tpu as pltpu

_LANE = 128
_SUBLANE = 16   # covers both bf16 (16,128) and f32 (8,128) packing granules


def _round_up(x, m):
    return (x + m - 1) // m * m


def _tcn_fused_kernel(x_ref, w_ref, b_ref, o_ref, buf_ref, *,
                      kernel_size, dilations, lengths, pads, c_pad,
                      align, act_dtype):
    """Fused TCN stack for one batch element (channels-last, lane-padded).

    x_ref  : (1, L0, c_pad)          channel-padded input (f32)
    w_ref  : (N*K, c_pad, c_pad)     per-layer, per-tap weights (act_dtype), VMEM-resident
    b_ref  : (N, 1, c_pad)           per-layer bias (f32, zero in padded channels)
    o_ref  : (1, L_final, c_pad)     output
    buf_ref: (2, l_buf, c_pad)       act_dtype ping-pong activation scratch (VMEM)
    """
    n_layers = len(dilations)
    K = kernel_size
    A = align                        # common aligned start offset of valid rows

    def zero_rows(n):
        return jnp.zeros((n, c_pad), act_dtype)

    # Left halo region [0, A) is never touched by any store below, so zeroing it
    # once per grid step keeps every layer's left padding zero.
    buf_ref[0, pl.ds(0, A), :] = zero_rows(A)
    if n_layers > 1:
        buf_ref[1, pl.ds(0, A), :] = zero_rows(A)

    # Stage level-0 input (doubles as the f32 -> act_dtype cast) + its right halo.
    l0, p0 = lengths[0], pads[0]
    buf_ref[0, pl.ds(A, l0), :] = x_ref[0].astype(act_dtype)
    if p0 > 0:
        buf_ref[0, pl.ds(A + l0, p0), :] = zero_rows(p0)

    # Statically unrolled layer loop; activations never leave VMEM.
    for i in range(n_layers):
        d = dilations[i]
        p = pads[i]
        l_in = lengths[i]
        l_out = l_in + p            # nn.Conv1d with padding=(K-1)*d, no Chomp1d
        cur = i % 2
        base = A - p                # start of the zero-padded window

        # K accumulated MXU dots (no im2col concat); f32 accumulation.
        y = jnp.dot(buf_ref[cur, pl.ds(base, l_out), :], w_ref[i * K],
                    preferred_element_type=jnp.float32)
        for k in range(1, K):
            y += jnp.dot(buf_ref[cur, pl.ds(base + k * d, l_out), :],
                         w_ref[i * K + k],
                         preferred_element_type=jnp.float32)
        y = jnp.maximum(y + b_ref[i], 0.0)
        # Dropout(p=0.2) is identity in eval mode.

        if i == n_layers - 1:
            o_ref[0] = y.astype(o_ref.dtype)
        else:
            nxt = (i + 1) % 2
            p_next = pads[i + 1]
            if p_next > 0:          # right halo for the next layer's read
                buf_ref[nxt, pl.ds(A + l_out, p_next), :] = zero_rows(p_next)
            buf_ref[nxt, pl.ds(A, l_out), :] = y.astype(act_dtype)


def _pack_params(params, kernel_size, c_pad, w_dtype):
    """(C_out, C_in, K) conv weights -> (N*K, c_pad, c_pad) per-tap matmul operands
    (zero-padded channels, layer-major / tap-minor) + (N, 1, c_pad) f32 biases."""
    ws, bs = [], []
    for w, b in params:
        c_out, c_in, K = w.shape
        assert K == kernel_size
        w_kio = jnp.transpose(w, (2, 1, 0))                        # (K, C_in, C_out)
        w_kio = jnp.pad(w_kio, ((0, 0), (0, c_pad - c_in), (0, c_pad - c_out)))
        for k in range(K):
            ws.append(w_kio[k].astype(w_dtype))
        bs.append(jnp.pad(b, (0, c_pad - c_out)).reshape(1, c_pad).astype(jnp.float32))
    return jnp.stack(ws), jnp.stack(bs)


def init_tcn_params(key, num_inputs, num_channels, kernel_size=2):
    """Deterministic init matching nn.Conv1d parameter shapes:
    weight (C_out, C_in, K), bias (C_out,)."""
    params = []
    in_ch = num_inputs
    for out_ch in num_channels:
        key, kw, kb = jax.random.split(key, 3)
        fan_in = in_ch * kernel_size
        bound = 1.0 / math.sqrt(fan_in)
        w = jax.random.uniform(
            kw, (out_ch, in_ch, kernel_size), jnp.float32, -bound, bound)
        b = jax.random.uniform(kb, (out_ch,), jnp.float32, -bound, bound)
        params.append((w, b))
        in_ch = out_ch
    return params


def temporal_conv_net(x_ncl, params, kernel_size=2, *,
                      compute_dtype=jnp.bfloat16, channels_last_output=False):
    """Forward pass. x_ncl: (B, C_in, L) in PyTorch NCW layout.
    Returns (B, C_last, L + sum_i (kernel_size-1)*2**i) by default, or
    (B, L_final, C_last) when channels_last_output=True (skips the HBM transpose)."""
    B, c_in, L = x_ncl.shape
    n_layers = len(params)
    K = kernel_size

    dilations = tuple(2 ** i for i in range(n_layers))
    pads = tuple((K - 1) * d for d in dilations)
    lengths = [L]
    for p in pads:
        lengths.append(lengths[-1] + p)
    l_final = lengths[-1]
    c_out_last = params[-1][0].shape[0]

    c_dims = [c_in] + [w.shape[0] for w, _ in params]
    c_pad = _round_up(max(c_dims), _LANE)

    # Pack weights once into per-tap, lane-padded layout (compute dtype).
    w_all, b_all = _pack_params(params, K, c_pad, compute_dtype)

    # Channels-last, lane-padded input (the only wrapper-side pad for the stack).
    h = jnp.transpose(x_ncl, (0, 2, 1))                   # (B, L, C_in)
    h = jnp.pad(h, ((0, 0), (0, 0), (0, c_pad - c_in)))   # (B, L, c_pad)

    align = _round_up(max(pads), _SUBLANE)                # common aligned valid-row start
    l_buf = _round_up(align + l_final, _SUBLANE)

    kernel = functools.partial(
        _tcn_fused_kernel,
        kernel_size=K, dilations=dilations, lengths=tuple(lengths),
        pads=pads, c_pad=c_pad, align=align, act_dtype=compute_dtype)

    act_bytes = jnp.dtype(compute_dtype).itemsize
    io_bytes = jnp.dtype(x_ncl.dtype).itemsize

    flops = sum(2 * B * (lengths[i] + pads[i]) * K * c_dims[i] * c_dims[i + 1]
                for i in range(n_layers))
    bytes_accessed = (io_bytes * B * (L + l_final) * c_pad
                      + act_bytes * w_all.size + 4 * b_all.size)

    # VMEM budget: ping-pong scratch + double-buffered I/O blocks + resident
    # (single-buffered) weights/bias + in-kernel f32 temporaries.
    vmem_est = (2 * l_buf * c_pad * act_bytes
                + 2 * L * c_pad * io_bytes
                + 2 * l_final * c_pad * io_bytes
                + act_bytes * w_all.size + 4 * b_all.size
                + (K + 1) * l_final * c_pad * 4)
    try:
        phys_vmem = pltpu.get_tpu_info().vmem_capacity_bytes
    except Exception:                                      # conservative fallback
        phys_vmem = 64 * 2 ** 20
    ceiling = (phys_vmem * 7) // 8                         # compiler-scratch headroom
    vmem_limit = int(min(max(int(1.5 * vmem_est), 32 * 2 ** 20), ceiling))

    out = pl.pallas_call(
        kernel,
        out_shape=jax.ShapeDtypeStruct((B, l_final, c_pad), x_ncl.dtype),
        grid=(B,),
        in_specs=[
            pl.BlockSpec((1, L, c_pad), lambda b: (b, 0, 0)),
            # Weights / bias: whole-array VMEM residency, fetched once,
            # single-buffered (no pipelining double-buffer).
            pl.BlockSpec(memory_space=pltpu.MemorySpace.VMEM),
            pl.BlockSpec(memory_space=pltpu.MemorySpace.VMEM),
        ],
        out_specs=pl.BlockSpec((1, l_final, c_pad), lambda b: (b, 0, 0)),
        scratch_shapes=[pltpu.VMEM((2, l_buf, c_pad), compute_dtype)],
        compiler_params=pltpu.CompilerParams(
            dimension_semantics=("parallel",),
            vmem_limit_bytes=vmem_limit),
        cost_estimate=pl.CostEstimate(
            flops=flops, transcendentals=0, bytes_accessed=bytes_accessed),
    )(h, w_all, b_all)

    out = out[:, :, :c_out_last]                 # strip lane padding
    if channels_last_output:
        return out                               # (B, L_final, C)
    return jnp.transpose(out, (0, 2, 1))         # PyTorch (B, C, L_final) layout


def _reference_tcn(x_ncl, params, kernel_size=2):
    """Pure-JAX reference using lax.conv_general_dilated (mirrors nn.Conv1d)."""
    h = x_ncl
    for i, (w, b) in enumerate(params):
        dilation = 2 ** i
        pad = (kernel_size - 1) * dilation
        y = jax.lax.conv_general_dilated(
            h, w,
            window_strides=(1,),
            padding=[(pad, pad)],
            rhs_dilation=(dilation,),
            dimension_numbers=("NCH", "OIH", "NCH"),
        )
        y = y + b.reshape(1, -1, 1)
        h = jnp.maximum(y, 0.0)
    return h


if __name__ == "__main__":
    key = jax.random.PRNGKey(0)
    k_x, k_p = jax.random.split(key)

    B, C_in, L = 2, 4, 16
    num_channels = [8, 16]
    kernel_size = 2

    x = jax.random.normal(k_x, (B, C_in, L), jnp.float32)
    params = init_tcn_params(k_p, C_in, num_channels, kernel_size)

    ref = jax.block_until_ready(_reference_tcn(x, params, kernel_size))

    # Strict check with f32 compute path.
    fwd_f32 = jax.jit(functools.partial(
        temporal_conv_net, kernel_size=kernel_size, compute_dtype=jnp.float32))
    out_f32 = jax.block_until_ready(fwd_f32(x, params))
    assert out_f32.shape == ref.shape, (out_f32.shape, ref.shape)
    assert jnp.allclose(out_f32, ref, atol=1e-4, rtol=1e-4), "f32 mismatch vs reference"

    # Default bf16 activation/weight path (f32 accumulation) -- looser tolerance.
    fwd_bf16 = jax.jit(functools.partial(temporal_conv_net, kernel_size=kernel_size))
    out_bf16 = jax.block_until_ready(fwd_bf16(x, params))
    assert out_bf16.shape == ref.shape, (out_bf16.shape, ref.shape)
    assert jnp.allclose(out_bf16.astype(jnp.float32), ref, atol=5e-2, rtol=5e-2), (
        "bf16 mismatch vs reference")

    print("KERNEL_OK")
</pallas_src>

<mosaic_0001>
module attributes {stable_mosaic.version = 11 : i64} {
  func.func @_tcn_fused_kernel(%arg0: i32, %arg1: memref<1x16x128xf32, #tpu.memory_space<vmem>>, %arg2: memref<4x128x128xf32, #tpu.memory_space<vmem>>, %arg3: memref<2x1x128xf32, #tpu.memory_space<vmem>>, %arg4: memref<1x19x128xf32, #tpu.memory_space<vmem>>, %arg5: memref<2x48x128xf32, #tpu.memory_space<vmem>>) attributes {dimension_semantics = [#tpu.dimension_semantics<parallel>], iteration_bounds = array<i64: 2>, scalar_prefetch = 0 : i64, scratch_operands = 1 : i64, tpu.core_type = #tpu.core_type<tc>, window_params = [{transform_indices = @transform_0, window_bounds = array<i64: 1, 16, 128>}, {pipeline_mode = #tpu.pipeline_mode<synchronous>, transform_indices = @transform_1, window_bounds = array<i64: 4, 128, 128>}, {pipeline_mode = #tpu.pipeline_mode<synchronous>, transform_indices = @transform_2, window_bounds = array<i64: 2, 1, 128>}, {transform_indices = @transform_3, window_bounds = array<i64: 1, 19, 128>}]} {
    %cst = arith.constant 0.000000e+00 : f32
    %0 = vector.broadcast %cst : f32 to vector<16x128xf32>
    %c0 = arith.constant 0 : index
    %c0_0 = arith.constant 0 : index
    %c0_1 = arith.constant 0 : index
    %1 = vector.load %arg5[%c0, %c0_0, %c0_1] : memref<2x48x128xf32, #tpu.memory_space<vmem>>, vector<1x16x128xf32>
    %2 = vector.shape_cast %1 : vector<1x16x128xf32> to vector<16x128xf32>
    %3 = vector.shape_cast %0 : vector<16x128xf32> to vector<1x16x128xf32>
    tpu.vector_store %arg5[%c0, %c0_0, %c0_1], %3 {strides = array<i32>} : memref<2x48x128xf32, #tpu.memory_space<vmem>>, vector<1x16x128xf32>,
    %cst_2 = arith.constant 0.000000e+00 : f32
    %4 = vector.broadcast %cst_2 : f32 to vector<16x128xf32>
    %c1 = arith.constant 1 : index
    %c0_3 = arith.constant 0 : index
    %c0_4 = arith.constant 0 : index
    %5 = vector.load %arg5[%c1, %c0_3, %c0_4] : memref<2x48x128xf32, #tpu.memory_space<vmem>>, vector<1x16x128xf32>
    %6 = vector.shape_cast %5 : vector<1x16x128xf32> to vector<16x128xf32>
    %7 = vector.shape_cast %4 : vector<16x128xf32> to vector<1x16x128xf32>
    tpu.vector_store %arg5[%c1, %c0_3, %c0_4], %7 {strides = array<i32>} : memref<2x48x128xf32, #tpu.memory_space<vmem>>, vector<1x16x128xf32>,
    %c0_5 = arith.constant 0 : index
    %c0_6 = arith.constant 0 : index
    %c0_7 = arith.constant 0 : index
    %8 = vector.load %arg1[%c0_5, %c0_6, %c0_7] : memref<1x16x128xf32, #tpu.memory_space<vmem>>, vector<1x16x128xf32>
    %9 = vector.shape_cast %8 : vector<1x16x128xf32> to vector<16x128xf32>
    %c0_8 = arith.constant 0 : index
    %c16 = arith.constant 16 : index
    %c0_9 = arith.constant 0 : index
    %10 = vector.load %arg5[%c0_8, %c16, %c0_9] : memref<2x48x128xf32, #tpu.memory_space<vmem>>, vector<1x16x128xf32>
    %11 = vector.shape_cast %10 : vector<1x16x128xf32> to vector<16x128xf32>
    %12 = vector.shape_cast %9 : vector<16x128xf32> to vector<1x16x128xf32>
    tpu.vector_store %arg5[%c0_8, %c16, %c0_9], %12 {strides = array<i32>} : memref<2x48x128xf32, #tpu.memory_space<vmem>>, vector<1x16x128xf32>,
    %cst_10 = arith.constant 0.000000e+00 : f32
    %13 = vector.broadcast %cst_10 : f32 to vector<1x128xf32>
    %c0_11 = arith.constant 0 : index
    %c32 = arith.constant 32 : index
    %c0_12 = arith.constant 0 : index
    %14 = vector.load %arg5[%c0_11, %c32, %c0_12] : memref<2x48x128xf32, #tpu.memory_space<vmem>>, vector<1x1x128xf32>
    %15 = vector.shape_cast %14 : vector<1x1x128xf32> to vector<1x128xf32>
    %16 = vector.shape_cast %13 : vector<1x128xf32> to vector<1x1x128xf32>
    tpu.vector_store %arg5[%c0_11, %c32, %c0_12], %16 {strides = array<i32>} : memref<2x48x128xf32, #tpu.memory_space<vmem>>, vector<1x1x128xf32>,
    %c0_13 = arith.constant 0 : index
    %c15 = arith.constant 15 : index
    %c0_14 = arith.constant 0 : index
    %17 = vector.load %arg5[%c0_13, %c15, %c0_14] : memref<2x48x128xf32, #tpu.memory_space<vmem>>, vector<1x17x128xf32>
    %18 = vector.shape_cast %17 : vector<1x17x128xf32> to vector<17x128xf32>
    %c0_15 = arith.constant 0 : index
    %c0_16 = arith.constant 0 : index
    %c0_17 = arith.constant 0 : index
    %19 = vector.load %arg2[%c0_15, %c0_16, %c0_17] : memref<4x128x128xf32, #tpu.memory_space<vmem>>, vector<1x128x128xf32>
    %20 = vector.shape_cast %19 : vector<1x128x128xf32> to vector<128x128xf32>
    %cst_18 = arith.constant dense<0.000000e+00> : vector<17x128xf32>
    %21 = tpu.matmul %18, %20, %cst_18 {dimension_numbers = #tpu.dot_dimension_numbers<[1], [0], [0], [1], [0, 0, 1, 1], [], []>} : vector<17x128xf32>, vector<128x128xf32>, vector<17x128xf32> -> vector<17x128xf32>
    %c0_19 = arith.constant 0 : index
    %c16_20 = arith.constant 16 : index
    %c0_21 = arith.constant 0 : index
    %22 = vector.load %arg5[%c0_19, %c16_20, %c0_21] : memref<2x48x128xf32, #tpu.memory_space<vmem>>, vector<1x17x128xf32>
    %23 = vector.shape_cast %22 : vector<1x17x128xf32> to vector<17x128xf32>
    %c1_22 = arith.constant 1 : index
    %c0_23 = arith.constant 0 : index
    %c0_24 = arith.constant 0 : index
    %24 = vector.load %arg2[%c1_22, %c0_23, %c0_24] : memref<4x128x128xf32, #tpu.memory_space<vmem>>, vector<1x128x128xf32>
    %25 = vector.shape_cast %24 : vector<1x128x128xf32> to vector<128x128xf32>
    %cst_25 = arith.constant dense<0.000000e+00> : vector<17x128xf32>
    %26 = tpu.matmul %23, %25, %cst_25 {dimension_numbers = #tpu.dot_dimension_numbers<[1], [0], [0], [1], [0, 0, 1, 1], [], []>} : vector<17x128xf32>, vector<128x128xf32>, vector<17x128xf32> -> vector<17x128xf32>
    %27 = arith.addf %21, %26 : vector<17x128xf32>
    %c0_26 = arith.constant 0 : index
    %c0_27 = arith.constant 0 : index
    %c0_28 = arith.constant 0 : index
    %28 = vector.load %arg3[%c0_26, %c0_27, %c0_28] : memref<2x1x128xf32, #tpu.memory_space<vmem>>, vector<1x1x128xf32>
    %29 = vector.shape_cast %28 : vector<1x1x128xf32> to vector<1x128xf32>
    %30 = vector.broadcast %29 : vector<1x128xf32> to vector<17x128xf32>
    %31 = arith.addf %27, %30 : vector<17x128xf32>
    %cst_29 = arith.constant 0.000000e+00 : f32
    %32 = vector.broadcast %cst_29 : f32 to vector<17x128xf32>
    %33 = arith.maximumf %31, %32 : vector<17x128xf32>
    %cst_30 = arith.constant 0.000000e+00 : f32
    %34 = vector.broadcast %cst_30 : f32 to vector<2x128xf32>
    %c1_31 = arith.constant 1 : index
    %c33 = arith.constant 33 : index
    %c0_32 = arith.constant 0 : index
    %35 = vector.load %arg5[%c1_31, %c33, %c0_32] : memref<2x48x128xf32, #tpu.memory_space<vmem>>, vector<1x2x128xf32>
    %36 = vector.shape_cast %35 : vector<1x2x128xf32> to vector<2x128xf32>
    %37 = vector.shape_cast %34 : vector<2x128xf32> to vector<1x2x128xf32>
    tpu.vector_store %arg5[%c1_31, %c33, %c0_32], %37 {strides = array<i32>} : memref<2x48x128xf32, #tpu.memory_space<vmem>>, vector<1x2x128xf32>,
    %c1_33 = arith.constant 1 : index
    %c16_34 = arith.constant 16 : index
    %c0_35 = arith.constant 0 : index
    %38 = vector.load %arg5[%c1_33, %c16_34, %c0_35] : memref<2x48x128xf32, #tpu.memory_space<vmem>>, vector<1x17x128xf32>
    %39 = vector.shape_cast %38 : vector<1x17x128xf32> to vector<17x128xf32>
    %40 = vector.shape_cast %33 : vector<17x128xf32> to vector<1x17x128xf32>
    tpu.vector_store %arg5[%c1_33, %c16_34, %c0_35], %40 {strides = array<i32>} : memref<2x48x128xf32, #tpu.memory_space<vmem>>, vector<1x17x128xf32>,
    %c1_36 = arith.constant 1 : index
    %c14 = arith.constant 14 : index
    %c0_37 = arith.constant 0 : index
    %41 = vector.load %arg5[%c1_36, %c14, %c0_37] : memref<2x48x128xf32, #tpu.memory_space<vmem>>, vector<1x19x128xf32>
    %42 = vector.shape_cast %41 : vector<1x19x128xf32> to vector<19x128xf32>
    %c2 = arith.constant 2 : index
    %c0_38 = arith.constant 0 : index
    %c0_39 = arith.constant 0 : index
    %43 = vector.load %arg2[%c2, %c0_38, %c0_39] : memref<4x128x128xf32, #tpu.memory_space<vmem>>, vector<1x128x128xf32>
    %44 = vector.shape_cast %43 : vector<1x128x128xf32> to vector<128x128xf32>
    %cst_40 = arith.constant dense<0.000000e+00> : vector<19x128xf32>
    %45 = tpu.matmul %42, %44, %cst_40 {dimension_numbers = #tpu.dot_dimension_numbers<[1], [0], [0], [1], [0, 0, 1, 1], [], []>} : vector<19x128xf32>, vector<128x128xf32>, vector<19x128xf32> -> vector<19x128xf32>
    %c1_41 = arith.constant 1 : index
    %c16_42 = arith.constant 16 : index
    %c0_43 = arith.constant 0 : index
    %46 = vector.load %arg5[%c1_41, %c16_42, %c0_43] : memref<2x48x128xf32, #tpu.memory_space<vmem>>, vector<1x19x128xf32>
    %47 = vector.shape_cast %46 : vector<1x19x128xf32> to vector<19x128xf32>
    %c3 = arith.constant 3 : index
    %c0_44 = arith.constant 0 : index
    %c0_45 = arith.constant 0 : index
    %48 = vector.load %arg2[%c3, %c0_44, %c0_45] : memref<4x128x128xf32, #tpu.memory_space<vmem>>, vector<1x128x128xf32>
    %49 = vector.shape_cast %48 : vector<1x128x128xf32> to vector<128x128xf32>
    %cst_46 = arith.constant dense<0.000000e+00> : vector<19x128xf32>
    %50 = tpu.matmul %47, %49, %cst_46 {dimension_numbers = #tpu.dot_dimension_numbers<[1], [0], [0], [1], [0, 0, 1, 1], [], []>} : vector<19x128xf32>, vector<128x128xf32>, vector<19x128xf32> -> vector<19x128xf32>
    %51 = arith.addf %45, %50 : vector<19x128xf32>
    %c1_47 = arith.constant 1 : index
    %c0_48 = arith.constant 0 : index
    %c0_49 = arith.constant 0 : index
    %52 = vector.load %arg3[%c1_47, %c0_48, %c0_49] : memref<2x1x128xf32, #tpu.memory_space<vmem>>, vector<1x1x128xf32>
    %53 = vector.shape_cast %52 : vector<1x1x128xf32> to vector<1x128xf32>
    %54 = vector.broadcast %53 : vector<1x128xf32> to vector<19x128xf32>
    %55 = arith.addf %51, %54 : vector<19x128xf32>
    %cst_50 = arith.constant 0.000000e+00 : f32
    %56 = vector.broadcast %cst_50 : f32 to vector<19x128xf32>
    %57 = arith.maximumf %55, %56 : vector<19x128xf32>
    %c0_51 = arith.constant 0 : index
    %c0_52 = arith.constant 0 : index
    %c0_53 = arith.constant 0 : index
    %58 = vector.load %arg4[%c0_51, %c0_52, %c0_53] : memref<1x19x128xf32, #tpu.memory_space<vmem>>, vector<1x19x128xf32>
    %59 = vector.shape_cast %58 : vector<1x19x128xf32> to vector<19x128xf32>
    %60 = vector.shape_cast %57 : vector<19x128xf32> to vector<1x19x128xf32>
    tpu.vector_store %arg4[%c0_51, %c0_52, %c0_53], %60 {strides = array<i32>} : memref<1x19x128xf32, #tpu.memory_space<vmem>>, vector<1x19x128xf32>,
    return
  }
  func.func @transform_0(%arg0: i32) -> (i32, i32, i32) {
    %c0_i32 = arith.constant 0 : i32
    %c0_i32_0 = arith.constant 0 : i32
    %c0_i32_1 = arith.constant 0 : i32
    return %arg0, %c0_i32, %c0_i32_0 : i32, i32, i32
  }
  func.func @transform_1(%arg0: i32) -> (i32, i32, i32) {
    %c0_i32 = arith.constant 0 : i32
    %c0_i32_0 = arith.constant 0 : i32
    %c0_i32_1 = arith.constant 0 : i32
    %c0_i32_2 = arith.constant 0 : i32
    return %c0_i32, %c0_i32_0, %c0_i32_1 : i32, i32, i32
  }
  func.func @transform_2(%arg0: i32) -> (i32, i32, i32) {
    %c0_i32 = arith.constant 0 : i32
    %c0_i32_0 = arith.constant 0 : i32
    %c0_i32_1 = arith.constant 0 : i32
    %c0_i32_2 = arith.constant 0 : i32
    return %c0_i32, %c0_i32_0, %c0_i32_1 : i32, i32, i32
  }
  func.func @transform_3(%arg0: i32) -> (i32, i32, i32) {
    %c0_i32 = arith.constant 0 : i32
    %c0_i32_0 = arith.constant 0 : i32
    %c0_i32_1 = arith.constant 0 : i32
    return %arg0, %c0_i32, %c0_i32_0 : i32, i32, i32
  }
}

</mosaic_0001>

<bundles_post_ra>
// kernel: temporal_conv_net.1
= control target key start
LH: loop header
LB: loop body
LE: loop exit
PB: predicated region body
PF: predicated region fallthrough
CT: control target
= control target key end

     0   :  { %s1110_s12 = smov 0   ;;  %s1393_s0 = inlined_call_operand.vmem [shape: f32[2,16,128], index: 0, kind: input, shape index: {}]   ;;  %s1394_s1 = inlined_call_operand.vmem [shape: f32[4,128,128], index: 1, kind: input, shape index: {}]   ;;  %s1395_s2 = inlined_call_operand.vmem [shape: f32[2,1,128], index: 2, kind: input, shape index: {}]   ;;  %s1396_s3 = inlined_call_operand.vmem [shape: f32[2,19,128], index: 3, kind: output, shape index: {}]  }
   0x1 LB: > { %s669_s13 = sadd.s32 4294967295, %s1085_s12   ;;  %p673_p0 = scmp.ge.s32.totalorder %s1085_s12, 1  ;;  %s1085_s12 = sphi %s1110_s12, %s13_s12  }
   0x2   : > { %p137_p1 = scmp.lt.s32.totalorder %s1085_s12, 3 }
   0x4   : > { %p138_p2 = pnand %p673_p0, %p137_p1 }
   0x5   : > { %v677_v0 = vld [vmem:[%s1394_s1 + $0x80] sm:$0xff] (!%p138_p2)  ;;  %v678_v1 = vld [vmem:[%s1394_s1 + $0x88] sm:$0xff] (!%p138_p2)  ;;  %v1087_v3 = vmov (!%p138_p2), 0.0|0.0   ;;  %v679_v6 = vld [vmem:[%s1394_s1 + $0x90] sm:$0xff] (!%p138_p2)  ;;  %v1088_v8 = vmov (!%p138_p2), 0.0   ;;  %p161_p3 = scmp.lt.s32.totalorder (!%p138_p2), %s669_s13, 1 }
   0x6   : > { %141 = sbr.rel (%p138_p2) target bundleno = 494 (0x1ee), region = 32  ;;  %v184_v2 = vld [vmem:[%s1394_s1] sm:$0xff] (!%p138_p2)  ;;  %971 = vmatprep.subr.bf16.mxu0 (!%p138_p2), %v1087_v3  ;;  %995 = vmatprep.subr.bf16.mxu1 (!%p138_p2), %v1087_v3  ;;  %v972_v4 = vpack.c.bf16 (!%p138_p2), %v678_v1, %v677_v0  ;;  %v185_v5 = vld [vmem:[%s1394_s1 + $0x8] sm:$0xff] (!%p138_p2)  ;;  %v680_v7 = vld [vmem:[%s1394_s1 + $0x98] sm:$0xff] (!%p138_p2)  ;;  %172 = vst [vmem:[#allocation2 + $0x8] sm:$0xff] (!%p138_p2), %v1088_v8  ;;  %vm1089_vm0 = vmmov (!%p138_p2), 0  }
   0x7   : > { %175 = vst [vmem:[#allocation2 + $0x38] sm:$0xff] (!%p138_p2), %v1088_v8  ;;  %180 = vst [vmem:[#allocation2 + $0x20] sm:$0x1] (!%p138_p2), %v1088_v8  ;;  %v996_v9 = vpack.c.bf16 (!%p138_p2), %v185_v5, %v184_v2  ;;  %v186_v10 = vld [vmem:[%s1394_s1 + $0x10] sm:$0xff] (!%p138_p2)  ;;  %v187_v11 = vld [vmem:[%s1394_s1 + $0x18] sm:$0xff] (!%p138_p2)  ;;  %839 = vmatprep.mubr.msk.f32.mxu0 (!%p138_p2), %vm1089_vm0, %v1088_v8  ;;  %880 = vmatprep.mubr.msk.f32.mxu1 (!%p138_p2), %vm1089_vm0, %v1088_v8  ;;  %v975_v12 = vpack.c.bf16 (!%p138_p2), %v680_v7, %v679_v6 }
   0x8   : > { %393 = vst [vmem:[#allocation2 + $0x51] sm:$0x3] (!%p138_p2), %v1088_v8  ;;  %973 = vmatpush3.bf16.msra.mxu0 (!%p138_p2), %v972_v4  ;;  %v999_v13 = vpack.c.bf16 (!%p138_p2), %v187_v11, %v186_v10  ;;  %v681_v14 = vld [vmem:[%s1394_s1 + $0xa0] sm:$0xff] (!%p138_p2)  ;;  %v682_v15 = vld [vmem:[%s1394_s1 + $0xa8] sm:$0xff] (!%p138_p2)  ;;  %v683_v20 = vld [vmem:[%s1394_s1 + $0xb0] sm:$0xff] (!%p138_p2) }
   0x9   : > { %997 = vmatpush3.bf16.msra.mxu1 (!%p138_p2), %v996_v9  ;;  %974 = vmatprep.subr.bf16.mxu0 (!%p138_p2), %v1087_v3  ;;  %v188_v16 = vld [vmem:[%s1394_s1 + $0x20] sm:$0xff] (!%p138_p2)  ;;  %v189_v17 = vld [vmem:[%s1394_s1 + $0x28] sm:$0xff] (!%p138_p2)  ;;  %v978_v18 = vpack.c.bf16 (!%p138_p2), %v682_v15, %v681_v14  ;;  %v684_v21 = vld [vmem:[%s1394_s1 + $0xb8] sm:$0xff] (!%p138_p2) }
   0xa   : > { %998 = vmatprep.subr.bf16.mxu1 (!%p138_p2), %v1087_v3  ;;  %v1002_v19 = vpack.c.bf16 (!%p138_p2), %v189_v17, %v188_v16  ;;  %v190_v22 = vld [vmem:[%s1394_s1 + $0x30] sm:$0xff] (!%p138_p2)  ;;  %v191_v23 = vld [vmem:[%s1394_s1 + $0x38] sm:$0xff] (!%p138_p2)  ;;  %v981_v25 = vpack.c.bf16 (!%p138_p2), %v684_v21, %v683_v20  ;;  %v685_v28 = vld [vmem:[%s1394_s1 + $0xc0] sm:$0xff] (!%p138_p2) }
   0xb   : > { %v1005_v27 = vpack.c.bf16 (!%p138_p2), %v191_v23, %v190_v22  ;;  %v686_v29 = vld [vmem:[%s1394_s1 + $0xc8] sm:$0xff] (!%p138_p2)  ;;  %v192_v30 = vld [vmem:[%s1394_s1 + $0x40] sm:$0xff] (!%p138_p2)  ;;  %v687_v34 = vld [vmem:[%s1394_s1 + $0xd0] sm:$0xff] (!%p138_p2) }
   0xc   : > { %976 = vmatpush3.bf16.msra.mxu0 (!%p138_p2), %v975_v12  ;;  %v193_v31 = vld [vmem:[%s1394_s1 + $0x48] sm:$0xff] (!%p138_p2)  ;;  %v984_v32 = vpack.c.bf16 (!%p138_p2), %v686_v29, %v685_v28  ;;  %v688_v35 = vld [vmem:[%s1394_s1 + $0xd8] sm:$0xff] (!%p138_p2)  ;;  %v194_v36 = vld [vmem:[%s1394_s1 + $0x50] sm:$0xff] (!%p138_p2) }
   0xd   : > { %s1398_s13 = smov (!%p161_p3, %s669_s13), 1  ;;  %1000 = vmatpush3.bf16.msra.mxu1 %v999_v13  ;;  %977 = vmatprep.subr.bf16.mxu0 %v1087_v3  ;;  %v1008_v33 = vpack.c.bf16 %v193_v31, %v192_v30  ;;  %v195_v37 = vld [vmem:[%s1394_s1 + $0x58] sm:$0xff]  ;;  %v987_v38 = vpack.c.bf16 %v688_v35, %v687_v34  ;;  %v689_v40 = vld [vmem:[%s1394_s1 + $0xe0] sm:$0xff]  ;;  %v690_v41 = vld [vmem:[%s1394_s1 + $0xe8] sm:$0xff] }
   0xe   : > { %s730_s11 = sshll.u32 %s1398_s13, 4  ;;  %1001 = vmatprep.subr.bf16.mxu1 %v1087_v3  ;;  %v1011_v39 = vpack.c.bf16 %v195_v37, %v194_v36  ;;  %v196_v42 = vld [vmem:[%s1394_s1 + $0x60] sm:$0xff]  ;;  %v197_v43 = vld [vmem:[%s1394_s1 + $0x68] sm:$0xff]  ;;  %v990_v44 = vpack.c.bf16 %v690_v41, %v689_v40  ;;  %v691_v46 = vld [vmem:[%s1394_s1 + $0xf0] sm:$0xff]  ;;  %s1067_s23 = smul.u32 24, %s1398_s13 }
   0xf   : > { %s165_s16 = scalar_lea.vmem %s1393_s0, %s730_s11  ;;  %v1014_v45 = vpack.c.bf16 %v197_v43, %v196_v42  ;;  %v692_v47 = vld [vmem:[%s1394_s1 + $0xf8] sm:$0xff]  ;;  %v198_v48 = vld [vmem:[%s1394_s1 + $0x70] sm:$0xff]  ;;  %v710_v52 = vld [vmem:[%s1394_s1 + $0x180] sm:$0xff] }
  0x10   : > { %v176_v24 = vld [vmem:[%s165_s16] sm:$0xff]  ;;  %979 = vmatpush3.bf16.msra.mxu0 %v978_v18  ;;  %v1186_v26 = vld [vmem:[%s165_s16 + $0x8] sm:$0xff]  ;;  %v199_v49 = vld [vmem:[%s1394_s1 + $0x78] sm:$0xff]  ;;  %v993_v50 = vpack.c.bf16 %v692_v47, %v691_v46  ;;  %s170_s28 = scalar_lea.vmem %s1396_s3, %s1067_s23 }
  0x11   : > { %178 = vst [vmem:[#allocation2 + $0x10] sm:$0xff] %v176_v24  ;;  %1003 = vmatpush3.bf16.msra.mxu1 %v1002_v19  ;;  %980 = vmatprep.subr.bf16.mxu0 %v1087_v3  ;;  %179 = vst [vmem:[#allocation2 + $0x18] sm:$0xff] %v1186_v26  ;;  %v1017_v51 = vpack.c.bf16 %v199_v49, %v198_v48  ;;  %v711_v53 = vld [vmem:[%s1394_s1 + $0x188] sm:$0xff]  ;;  %v694_v54 = vld [vmem:[%s1394_s1 + $0x100] sm:$0xff] }
  0x12   : > { %1004 = vmatprep.subr.bf16.mxu1 %v1087_v3  ;;  %v695_v55 = vld [vmem:[%s1394_s1 + $0x108] sm:$0xff]  ;;  %v1020_v57 = vpack.c.bf16 %v711_v53, %v710_v52  ;;  %v712_v59 = vld [vmem:[%s1394_s1 + $0x190] sm:$0xff]  ;;  %v713_v60 = vld [vmem:[%s1394_s1 + $0x198] sm:$0xff] }
  0x13   : > { %v1044_v58 = vpack.c.bf16 %v695_v55, %v694_v54  ;;  %v696_v61 = vld [vmem:[%s1394_s1 + $0x110] sm:$0xff]  ;;  %v697_v62 = vld [vmem:[%s1394_s1 + $0x118] sm:$0xff]  ;;  %v1023_v0 = vpack.c.bf16 %v713_v60, %v712_v59  ;;  %v714_v2 = vld [vmem:[%s1394_s1 + $0x1a0] sm:$0xff] }
  0x14   : > { %982 = vmatpush3.bf16.msra.mxu0 %v981_v25  ;;  %v1047_v1 = vpack.c.bf16 %v697_v62, %v696_v61  ;;  %v715_v4 = vld [vmem:[%s1394_s1 + $0x1a8] sm:$0xff]  ;;  %v698_v5 = vld [vmem:[%s1394_s1 + $0x120] sm:$0xff]  ;;  %v716_v12 = vld [vmem:[%s1394_s1 + $0x1b0] sm:$0xff] }
  0x15   : > { %1006 = vmatpush3.bf16.msra.mxu1 %v1005_v27  ;;  %983 = vmatprep.subr.bf16.mxu0 %v1087_v3  ;;  %v699_v6 = vld [vmem:[%s1394_s1 + $0x128] sm:$0xff]  ;;  %v202_v7 = vld [vmem:[#allocation2 + $0x20] sm:$0x1]  ;;  %v1026_v10 = vpack.c.bf16 %v715_v4, %v714_v2  ;;  %v717_v13 = vld [vmem:[%s1394_s1 + $0x1b8] sm:$0xff] }
  0x16   : > { %1007 = vmatprep.subr.bf16.mxu1 %v1087_v3  ;;  %v1050_v11 = vpack.c.bf16 %v699_v6, %v698_v5  ;;  %v700_v14 = vld [vmem:[%s1394_s1 + $0x130] sm:$0xff]  ;;  %v701_v15 = vld [vmem:[%s1394_s1 + $0x138] sm:$0xff]  ;;  %v1029_v16 = vpack.c.bf16 %v717_v13, %v716_v12  ;;  %v718_v18 = vld [vmem:[%s1394_s1 + $0x1c0] sm:$0xff] }
  0x17   : > { %v1053_v17 = vpack.c.bf16 %v701_v15, %v700_v14  ;;  %v719_v19 = vld [vmem:[%s1394_s1 + $0x1c8] sm:$0xff]  ;;  %v720_v21 = vld [vmem:[%s1394_s1 + $0x1d0] sm:$0xff]  ;;  %v721_v22 = vld [vmem:[%s1394_s1 + $0x1d8] sm:$0xff] }
  0x18   : > { %985 = vmatpush3.bf16.msra.mxu0 %v984_v32  ;;  %v181_v56 = vld [vmem:[#allocation2 + $0xf] sm:$0xff]  ;;  %v182_v63 = vld [vmem:[#allocation2 + $0x17] sm:$0xff]  ;;  %v183_v9 = vld [vmem:[#allocation2 + $0x1f] sm:$0x1]  ;;  %v1032_v20 = vpack.c.bf16 %v719_v19, %v718_v18  ;;  %v1035_v23 = vpack.c.bf16 %v721_v22, %v720_v21 }
  0x19   : > { %1009 = vmatpush3.bf16.msra.mxu1 %v1008_v33  ;;  %986 = vmatprep.subr.bf16.mxu0 %v1087_v3  ;;  %v703_v25 = vld [vmem:[%s1394_s1 + $0x148] sm:$0xff]  ;;  %v704_v30 = vld [vmem:[%s1394_s1 + $0x150] sm:$0xff]  ;;  %v705_v31 = vld [vmem:[%s1394_s1 + $0x158] sm:$0xff] }
  0x1a   : > { %1010 = vmatprep.subr.bf16.mxu1 %v1087_v3  ;;  %v723_v28 = vld [vmem:[%s1394_s1 + $0x1e8] sm:$0xff]  ;;  %v1059_v32 = vpack.c.bf16 %v705_v31, %v704_v30  ;;  %v724_v33 = vld [vmem:[%s1394_s1 + $0x1f0] sm:$0xff]  ;;  %v725_v34 = vld [vmem:[%s1394_s1 + $0x1f8] sm:$0xff] }
  0x1b   : > { %v1041_v35 = vpack.c.bf16 %v725_v34, %v724_v33  ;;  %v706_v36 = vld [vmem:[%s1394_s1 + $0x160] sm:$0xff]  ;;  %v707_v37 = vld [vmem:[%s1394_s1 + $0x168] sm:$0xff]  ;;  %v709_v40 = vld [vmem:[%s1394_s1 + $0x178] sm:$0xff] }
  0x1c   : > { %988 = vmatpush3.bf16.msra.mxu0 %v987_v38  ;;  %v1062_v38 = vpack.c.bf16 %v707_v37, %v706_v36 }
  0x1d   : > { %1012 = vmatpush3.bf16.msra.mxu1 %v1011_v39  ;;  %989 = vmatprep.subr.bf16.mxu0 %v1087_v3  ;;  %v708_v39 = vld [vmem:[%s1394_s1 + $0x170] sm:$0xff] }
  0x1e   : > { %1013 = vmatprep.subr.bf16.mxu1 %v1087_v3  ;;  %v1065_v41 = vpack.c.bf16 %v709_v40, %v708_v39 }
  0x20   : > { %991 = vmatpush3.bf16.msra.mxu0 %v990_v44  ;;  %v693_v44 = vld [vmem:[%s1395_s2] ss:$0 sm:$0xff] }
  0x21   : > { %1015 = vmatpush3.bf16.msra.mxu1 %v1014_v45  ;;  %992 = vmatprep.subr.bf16.mxu0 %v1087_v3 }
  0x22   : > { %1016 = vmatprep.subr.bf16.mxu1 %v1087_v3 }
  0x24   : > { %994 = vmatpush3.bf16.msra.mxu0 %v993_v50 }
  0x25   : > { %1018 = vmatpush3.bf16.msra.mxu1 %v1017_v51  ;;  %1019 = vmatprep.subr.bf16.mxu0 %v1087_v3 }
  0x26   : > { %1043 = vmatprep.subr.bf16.mxu1 %v1087_v3 }
  0x27   : > { %840 = vmatmul.mubr.f32.vlgmr.msra.gmra.mrb[0].mxu0 %v176_v24  ;;  %v702_v24 = vld [vmem:[%s1394_s1 + $0x140] sm:$0xff] }
  0x28   : > { %881 = vmatmul.mubr.f32.vlgmr.msra.gmra.mrb[0].mxu1 %v181_v56  ;;  %842 = vmatprep.mubr.msk.f32.mxu0 %vm1089_vm0, %v1088_v8  ;;  %v1056_v27 = vpack.c.bf16 %v703_v25, %v702_v24 }
  0x29   : > { %883 = vmatprep.mubr.msk.f32.mxu1 %vm1089_vm0, %v1088_v8  ;;  %1021 = vmatpush3.bf16.msra.mxu0 %v1020_v57 }
  0x2a   : > { %1045 = vmatpush3.bf16.msra.mxu1 %v1044_v58  ;;  %1022 = vmatprep.subr.bf16.mxu0 %v1087_v3 }
  0x2b   : > { %843 = vmatmul.mubr.f32.gmra.mrb[2].mxu0 %v1186_v26  ;;  %1046 = vmatprep.subr.bf16.mxu1 %v1087_v3  ;;  %v722_v26 = vld [vmem:[%s1394_s1 + $0x1e0] sm:$0xff] }
  0x2c   : > { %884 = vmatmul.mubr.f32.gmra.mrb[2].mxu1 %v182_v63  ;;  %845 = vmatprep.mubr.msk.f32.mxu0 %vm1089_vm0, %v1088_v8  ;;  %v1038_v29 = vpack.c.bf16 %v723_v28, %v722_v26 }
  0x2d   : > { %886 = vmatprep.mubr.msk.f32.mxu1 %vm1089_vm0, %v1088_v8  ;;  %1024 = vmatpush3.bf16.msra.mxu0 %v1023_v0 }
  0x2e   : > { %1048 = vmatpush3.bf16.msra.mxu1 %v1047_v1  ;;  %1025 = vmatprep.subr.bf16.mxu0 %v1087_v3 }
  0x2f   : > { %846 = vmatmul.mubr.f32.gmra.mrb[4].mxu0 %v202_v7  ;;  %1049 = vmatprep.subr.bf16.mxu1 %v1087_v3 }
  0x30   : > { %887 = vmatmul.mubr.f32.gmra.mrb[4].mxu1 %v183_v9  ;;  %921 = vmatprep.mubr.msk.f32.mxu0 %vm1089_vm0, %v1088_v8 }
  0x31   : > { %1027 = vmatpush3.bf16.msra.mxu0 %v1026_v10  ;;  %962 = vmatprep.mubr.msk.f32.mxu1 %vm1089_vm0, %v1088_v8  ;;  %v727_v10 = vld [vmem:[%s1395_s2 + $0x1] ss:$0 sm:$0xff] }
  0x32   : > { %1051 = vmatpush3.bf16.msra.mxu1 %v1050_v11  ;;  %1028 = vmatprep.subr.bf16.mxu0 %v1087_v3 }
  0x33   : > { %1052 = vmatprep.subr.bf16.mxu1 %v1087_v3 }
  0x35   : > { %1030 = vmatpush3.bf16.msra.mxu0 %v1029_v16 }
  0x36   : > { %1054 = vmatpush3.bf16.msra.mxu1 %v1053_v17  ;;  %1031 = vmatprep.subr.bf16.mxu0 %v1087_v3 }
  0x37   : > { %1055 = vmatprep.subr.bf16.mxu1 %v1087_v3 }
  0x39   : > { %1033 = vmatpush3.bf16.msra.mxu0 %v1032_v20 }
  0x3a   : > { %1034 = vmatprep.subr.bf16.mxu0 %v1087_v3  ;;  %1057 = vmatpush3.bf16.msra.mxu1 %v1056_v27 }
  0x3b   : > { %1058 = vmatprep.subr.bf16.mxu1 %v1087_v3 }
  0x3d   : > { %1036 = vmatpush3.bf16.msra.mxu0 %v1035_v23 }
  0x3e   : > { %1037 = vmatprep.subr.bf16.mxu0 %v1087_v3  ;;  %1060 = vmatpush3.bf16.msra.mxu1 %v1059_v32 }
  0x3f   : > { %1061 = vmatprep.subr.bf16.mxu1 %v1087_v3 }
  0x41   : > { %1039 = vmatpush3.bf16.msra.mxu0 %v1038_v29 }
  0x42   : > { %1040 = vmatprep.subr.bf16.mxu0 %v1087_v3  ;;  %1063 = vmatpush3.bf16.msra.mxu1 %v1062_v38 }
  0x43   : > { %1064 = vmatprep.subr.bf16.mxu1 %v1087_v3 }
  0x45   : > { %1042 = vmatpush3.bf16.msra.mxu0 %v1041_v35 }
  0x46   : > { %1066 = vmatpush3.bf16.msra.mxu1 %v1065_v41 }
  0xfa   : > { %v286_v42 = vpop.f32.mrb[0].mxu0 }
  0xfb   : > { %v366_v43 = vpop.f32.mrb[0].mxu1  ;;  %v841_v45 = vpop.f32.mrb[1].mxu0 }
  0xfc   : > { %v367_v46 = vadd.f32 %v366_v43, %v286_v42  ;;  %v882_v47 = vpop.f32.mrb[1].mxu1 }
  0xfe   : > { %v387_v3 = vadd.f32 %v693_v44, %v367_v46  ;;  %v291_v48 = vpop.f32.mrb[2].mxu0 }
  0xff   : > { %v371_v49 = vpop.f32.mrb[2].mxu1  ;;  %v844_v50 = vpop.f32.mrb[3].mxu0 }
 0x100   : > { %v390_v51 = vmax.f32 %v387_v3, 0.0  ;;  %v372_v52 = vadd.f32 %v371_v49, %v291_v48  ;;  %v885_v53 = vpop.f32.mrb[3].mxu1 }
 0x102   : > { %394 = vst [vmem:[#allocation2 + $0x40] sm:$0xff] %v390_v51  ;;  %v388_v54 = vadd.f32 %v693_v44, %v372_v52  ;;  %v296_v55 = vpop.f32.mrb[4].mxu0  ;;  %922 = vmatmul.mubr.f32.vlgmr.msra.gmra.mrb[6].mxu0 %v390_v51 }
 0x103   : > { %v376_v56 = vpop.f32.mrb[4].mxu1  ;;  %v847_v57 = vpop.f32.mrb[5].mxu0  ;;  %924 = vmatprep.mubr.msk.f32.mxu0 %vm1089_vm0, %v1088_v8 }
 0x104   : > { %v391_v58 = vmax.f32 %v388_v54, 0.0  ;;  %v377_v59 = vadd.f32 %v376_v56, %v296_v55  ;;  %v888_v60 = vpop.f32.mrb[5].mxu1 }
 0x106   : > { %395 = vst [vmem:[#allocation2 + $0x48] sm:$0xff] %v391_v58  ;;  %v389_v61 = vadd.f32 %v693_v44, %v377_v59  ;;  %925 = vmatmul.mubr.f32.gmra.mrb[8].mxu0 %v391_v58 }
 0x107   : > { %927 = vmatprep.mubr.msk.f32.mxu0 %vm1089_vm0, %v1088_v8 }
 0x108   : > { %v392_v62 = vmax.f32 %v389_v61, 0.0 }
 0x109   : > { %v397_v63 = vld [vmem:[#allocation2 + $0x3e] sm:$0xff] }
 0x10a   : > { %396 = vst [vmem:[#allocation2 + $0x50] sm:$0x1] %v392_v62  ;;  %963 = vmatmul.mubr.f32.vlgmr.msra.gmra.mrb[6].mxu1 %v397_v63 }
 0x10b   : > { %965 = vmatprep.mubr.msk.f32.mxu1 %vm1089_vm0, %v1088_v8 }
 0x10d   : > { %v398_v0 = vld [vmem:[#allocation2 + $0x46] sm:$0xff] }
 0x10e   : > { %966 = vmatmul.mubr.f32.gmra.mrb[8].mxu1 %v398_v0 }
 0x10f   : > { %968 = vmatprep.mubr.msk.f32.mxu1 %vm1089_vm0, %v1088_v8 }
 0x111   : > { %v419_v1 = vld [vmem:[#allocation2 + $0x50] sm:$0x7] }
 0x112   : > { %v399_v2 = vld [vmem:[#allocation2 + $0x4e] sm:$0x7]  ;;  %928 = vmatmul.mubr.f32.gmra.mrb[10].mxu0 %v419_v1 }
 0x113   : > { %969 = vmatmul.mubr.f32.gmra.mrb[10].mxu1 %v399_v2 }
 0x1d5   : > { %v503_v4 = vpop.f32.mrb[6].mxu0 }
 0x1d6   : > { %v923_v5 = vpop.f32.mrb[7].mxu0 }
 0x1d9   : > { %v508_v6 = vpop.f32.mrb[8].mxu0 }
 0x1da   : > { %v926_v7 = vpop.f32.mrb[9].mxu0 }
 0x1dd   : > { %v583_v9 = vpop.f32.mrb[6].mxu1 }
 0x1de   : > { %v584_v11 = vadd.f32 %v583_v9, %v503_v4  ;;  %v964_v12 = vpop.f32.mrb[7].mxu1 }
 0x1e0   : > { %v605_v13 = vadd.f32 %v727_v10, %v584_v11 }
 0x1e1   : > { %v588_v8 = vpop.f32.mrb[8].mxu1 }
 0x1e2   : > { %v608_v14 = vmax.f32 %v605_v13, 0.0  ;;  %v589_v15 = vadd.f32 %v588_v8, %v508_v6  ;;  %v967_v16 = vpop.f32.mrb[9].mxu1 }
 0x1e4   : > { %611 = vst [vmem:[%s170_s28] sm:$0xff] %v608_v14  ;;  %v606_v17 = vadd.f32 %v727_v10, %v589_v15 }
 0x1e5   : > { %v513_v18 = vpop.f32.mrb[10].mxu0 }
 0x1e6   : > { %v593_v19 = vpop.f32.mrb[10].mxu1  ;;  %v609_v20 = vmax.f32 %v606_v17, 0.0  ;;  %v929_v22 = vpop.f32.mrb[11].mxu0 }
 0x1e7   : > { %v594_v21 = vadd.f32 %v593_v19, %v513_v18  ;;  %v970_v23 = vpop.f32.mrb[11].mxu1 }
 0x1e8   : > { %612 = vst [vmem:[%s170_s28 + $0x8] sm:$0xff] %v609_v20 }
 0x1e9   : > { %v607_v24 = vadd.f32 %v727_v10, %v594_v21 }
 0x1eb   : > { %v610_v25 = vmax.f32 %v607_v24, 0.0 }
 0x1ed   : > { %613 = vst [vmem:[%s170_s28 + $0x10] sm:$0x7] %v610_v25 }
 0x1ee PF: > { %s13_s12 = sadd.s32 1, %s1085_s12  }
 0x1ef   : > { %p10_p4 = scmp.ge.s32.totalorder %s13_s12, 4  }
 0x1f1   :  { %12 = sbr.rel (!%p10_p4) target bundleno = 1 (0x1), region = 67 }

</bundles_post_ra>
